<compile_context>
chip_gen: v7x
topology: tpu7x:2x2x1
jax: 0.10.0
libtpu: 0.0.40
codegen_flags: <defaults>
</compile_context>

<pallas_src>
import functools
import math

import jax
import jax.numpy as jnp
import numpy as np
from jax import lax
from jax.experimental import pallas as pl
from jax.experimental.pallas import tpu as pltpu


# --------------------------------------------------------------------------- #
# Kernel
# --------------------------------------------------------------------------- #
def wayconv_kernel(xf_ref, wc_ref, bc_ref, w1_ref, b1_ref, w2_ref, b2_ref,
                   g_ref, be_ref, out_ref, *, out_dims, matmul_dtype):
    # Folded conv + ReLU: single (TB, 2N) @ (2N, L*fc) MXU pass (bf16 operands,
    # f32 accumulate).  Bias add + ReLU in f32.
    x = xf_ref[...].astype(matmul_dtype)
    h = jnp.dot(x, wc_ref[...], preferred_element_type=jnp.float32) + bc_ref[...]
    h = jnp.maximum(h, 0.0)

    # linear1 + ReLU
    h1 = jnp.dot(h.astype(matmul_dtype), w1_ref[...],
                 preferred_element_type=jnp.float32) + b1_ref[...]
    h1 = jnp.maximum(h1, 0.0)

    # linear2 (true out_dims width; Mosaic masks the partial lane group)
    h2 = jnp.dot(h1.astype(matmul_dtype), w2_ref[...],
                 preferred_element_type=jnp.float32) + b2_ref[...]

    # LayerNorm via sum / sum-of-squares: the two cross-lane reductions are
    # independent (no mu -> diff -> var serialization), no masking ops needed.
    inv_n = 1.0 / out_dims
    s1 = jnp.sum(h2, axis=-1, keepdims=True)
    s2 = jnp.sum(h2 * h2, axis=-1, keepdims=True)
    mu = s1 * inv_n
    var = s2 * inv_n - mu * mu
    y = (h2 - mu) * lax.rsqrt(var + 1e-5)
    y = y * g_ref[...] + be_ref[...]
    out_ref[...] = jnp.tanh(y)


# --------------------------------------------------------------------------- #
# Parameter preparation (runs ONCE, outside the per-call path)
# --------------------------------------------------------------------------- #
def prepare_wayconv_params(params, num_waypoints, matmul_dtype=jnp.bfloat16):
    w_conv, b_conv, W1, b1, W2, b2, gamma, beta = [
        np.asarray(p, np.float32) for p in params
    ]
    fc = w_conv.shape[0]
    out_dims = W2.shape[0]
    N = num_waypoints
    L = N - 1

    # Fold the Conv1d(2, fc, 2) into a dense (2N, L*fc) matrix:
    #   M[(t+k)*2 + c, t*fc + o] = w_conv[o, c, k]
    M = np.zeros((2 * N, L * fc), np.float32)
    for t in range(L):
        for k in range(2):
            M[(t + k) * 2:(t + k) * 2 + 2, t * fc:(t + 1) * fc] = w_conv[:, :, k].T
    bconv_tiled = np.tile(b_conv, L).reshape(1, L * fc)

    # PyTorch flattens the conv output channel-major (flat[o*L + t]); the kernel
    # flattens t-major (h[t*fc + o]).  Re-permute W1 accordingly (exact math).
    W1t = W1.reshape(fc, fc, L).transpose(2, 1, 0).reshape(L * fc, fc)

    # Matmul operands in matmul_dtype (bf16 by default -> native MXU path on
    # v5e/v6e/v7x); biases / LN affine stay f32.
    weights = (
        jnp.asarray(M, matmul_dtype),
        jnp.asarray(bconv_tiled, jnp.float32),
        jnp.asarray(W1t, matmul_dtype),
        jnp.asarray(b1.reshape(1, fc), jnp.float32),
        jnp.asarray(W2.T, matmul_dtype),                 # (fc, out_dims), unpadded
        jnp.asarray(b2.reshape(1, out_dims), jnp.float32),
        jnp.asarray(gamma.reshape(1, out_dims), jnp.float32),
        jnp.asarray(beta.reshape(1, out_dims), jnp.float32),
    )
    return {
        "weights": weights,
        "num_waypoints": N,
        "fc_dims": fc,
        "out_dims": out_dims,
        "matmul_dtype": matmul_dtype,
    }


# --------------------------------------------------------------------------- #
# Forward wrapper
# --------------------------------------------------------------------------- #
def wayconv1d_forward(x, prepped, *, tb_max=2048, min_grid_steps=4):
    """x: (B, num_waypoints, 2) float32 (same layout as the PyTorch forward input)."""
    M, bconv, W1t, b1r, W2t, b2r, gr, ber = prepped["weights"]
    N = prepped["num_waypoints"]
    out_dims = prepped["out_dims"]
    matmul_dtype = prepped["matmul_dtype"]

    B = x.shape[0]
    feat_in = 2 * N
    # Row-major (B, N, 2) -> (B, 2N) is a metadata-only reshape in XLA.
    x_flat = x.reshape(B, feat_in).astype(jnp.float32)

    # Batch tile: as large as tb_max, but for big batches cap it so the grid has
    # >= min_grid_steps steps (keeps both v7x TensorCores busy via "parallel").
    TB = min(B, tb_max)
    if B > tb_max:
        TB = min(TB, max(8, math.ceil(math.ceil(B / min_grid_steps) / 8) * 8))
    if TB < B:
        TB = max(8, (TB // 8) * 8)       # keep the tile a multiple of 8 sublanes
    grid = (pl.cdiv(B, TB),)

    def full_spec(arr):
        return pl.BlockSpec(arr.shape, lambda i: (0, 0))

    in_specs = [
        pl.BlockSpec((TB, feat_in), lambda i: (i, 0)),
        full_spec(M), full_spec(bconv), full_spec(W1t), full_spec(b1r),
        full_spec(W2t), full_spec(b2r), full_spec(gr), full_spec(ber),
    ]
    out_specs = pl.BlockSpec((TB, out_dims), lambda i: (i, 0))

    kernel = functools.partial(wayconv_kernel, out_dims=out_dims,
                               matmul_dtype=matmul_dtype)
    return pl.pallas_call(
        kernel,
        out_shape=jax.ShapeDtypeStruct((B, out_dims), jnp.float32),
        grid=grid,
        in_specs=in_specs,
        out_specs=out_specs,
        compiler_params=pltpu.CompilerParams(
            dimension_semantics=("parallel",),       # shards batch across TCs (v7x)
            vmem_limit_bytes=32 * 1024 * 1024,
        ),
    )(x_flat, M, bconv, W1t, b1r, W2t, b2r, gr, ber)


# --------------------------------------------------------------------------- #
# Pure-JAX reference of the PyTorch forward (NCW conv, channel-major flatten)
# --------------------------------------------------------------------------- #
def reference_forward(x, params):
    w_conv, b_conv, W1, b1, W2, b2, gamma, beta = params
    B, N, _ = x.shape
    L = N - 1
    xin = jnp.transpose(x, (0, 2, 1))                        # (B, 2, N)
    windows = jnp.stack([xin[:, :, :L], xin[:, :, 1:]], 2)   # (B, 2, 2, L) = [b,c,k,t]
    conv = jnp.einsum('ock,bckt->bot', w_conv, windows) + b_conv[None, :, None]
    conv = jnp.maximum(conv, 0.0)
    flat = conv.reshape(B, -1)                               # (B, fc*L), channel-major
    h1 = jnp.maximum(flat @ W1.T + b1, 0.0)
    h2 = h1 @ W2.T + b2
    mu = jnp.mean(h2, -1, keepdims=True)
    var = jnp.mean(jnp.square(h2 - mu), -1, keepdims=True)
    y = (h2 - mu) * lax.rsqrt(var + 1e-5) * gamma + beta
    return jnp.tanh(y)


if __name__ == "__main__":
    num_waypoints, fc_dims, out_dims = 8, 32, 16
    L = num_waypoints - 1
    n_element = fc_dims * L

    key = jax.random.PRNGKey(0)
    ks = jax.random.split(key, 8)
    # deterministic synthetic parameters (same shapes as the PyTorch module)
    w_conv = 0.1 * jax.random.normal(ks[0], (fc_dims, 2, 2), jnp.float32)   # Conv1d(2, fc, 2)
    b_conv = 0.1 * jax.random.normal(ks[1], (fc_dims,), jnp.float32)
    W1 = 0.1 * jax.random.normal(ks[2], (fc_dims, n_element), jnp.float32)  # Linear(n_element, fc)
    b1 = 0.1 * jax.random.normal(ks[3], (fc_dims,), jnp.float32)
    W2 = 0.1 * jax.random.normal(ks[4], (out_dims, fc_dims), jnp.float32)   # Linear(fc, out)
    b2 = 0.1 * jax.random.normal(ks[5], (out_dims,), jnp.float32)
    gamma = jnp.ones((out_dims,), jnp.float32)                              # LayerNorm default init
    beta = jnp.zeros((out_dims,), jnp.float32)
    params = (w_conv, b_conv, W1, b1, W2, b2, gamma, beta)

    prepped_bf16 = prepare_wayconv_params(params, num_waypoints, jnp.bfloat16)
    prepped_f32 = prepare_wayconv_params(params, num_waypoints, jnp.float32)

    # Small test (single grid step, block == full batch).
    B = 2
    x = jax.random.normal(ks[6], (B, num_waypoints, 2), jnp.float32)
    ref = jax.block_until_ready(reference_forward(x, params))

    out_f32 = jax.block_until_ready(wayconv1d_forward(x, prepped_f32))
    np.testing.assert_allclose(np.asarray(out_f32), np.asarray(ref),
                               rtol=1e-5, atol=1e-5)
    out_bf16 = jax.block_until_ready(wayconv1d_forward(x, prepped_bf16))
    np.testing.assert_allclose(np.asarray(out_bf16), np.asarray(ref),
                               rtol=3e-2, atol=3e-2)
    assert out_bf16.shape == (B, out_dims)

    # Gridded test (multiple batch tiles, parallel grid axis).
    B2 = 48
    x2 = jax.random.normal(ks[7], (B2, num_waypoints, 2), jnp.float32)
    ref2 = jax.block_until_ready(reference_forward(x2, params))

    out2_f32 = jax.block_until_ready(wayconv1d_forward(x2, prepped_f32, tb_max=16))
    np.testing.assert_allclose(np.asarray(out2_f32), np.asarray(ref2),
                               rtol=1e-5, atol=1e-5)
    out2_bf16 = jax.block_until_ready(wayconv1d_forward(x2, prepped_bf16, tb_max=16))
    np.testing.assert_allclose(np.asarray(out2_bf16), np.asarray(ref2),
                               rtol=3e-2, atol=3e-2)
    assert out2_bf16.shape == (B2, out_dims)

    print("KERNEL_OK")
</pallas_src>

<mosaic_0001>
module attributes {stable_mosaic.version = 11 : i64} {
  func.func @wayconv_kernel(%arg0: i32, %arg1: memref<2x16xf32, #tpu.memory_space<vmem>>, %arg2: memref<16x224xf32, #tpu.memory_space<vmem>>, %arg3: memref<1x224xf32, #tpu.memory_space<vmem>>, %arg4: memref<224x32xf32, #tpu.memory_space<vmem>>, %arg5: memref<1x32xf32, #tpu.memory_space<vmem>>, %arg6: memref<32x16xf32, #tpu.memory_space<vmem>>, %arg7: memref<1x16xf32, #tpu.memory_space<vmem>>, %arg8: memref<1x16xf32, #tpu.memory_space<vmem>>, %arg9: memref<1x16xf32, #tpu.memory_space<vmem>>, %arg10: memref<2x16xf32, #tpu.memory_space<vmem>>) attributes {dimension_semantics = [#tpu.dimension_semantics<parallel>], iteration_bounds = array<i64: 1>, scalar_prefetch = 0 : i64, scratch_operands = 0 : i64, tpu.core_type = #tpu.core_type<tc>, window_params = [{transform_indices = @transform_0, window_bounds = array<i64: 2, 16>}, {pipeline_mode = #tpu.pipeline_mode<synchronous>, transform_indices = @transform_1, window_bounds = array<i64: 16, 224>}, {pipeline_mode = #tpu.pipeline_mode<synchronous>, transform_indices = @transform_2, window_bounds = array<i64: 1, 224>}, {pipeline_mode = #tpu.pipeline_mode<synchronous>, transform_indices = @transform_3, window_bounds = array<i64: 224, 32>}, {pipeline_mode = #tpu.pipeline_mode<synchronous>, transform_indices = @transform_4, window_bounds = array<i64: 1, 32>}, {pipeline_mode = #tpu.pipeline_mode<synchronous>, transform_indices = @transform_5, window_bounds = array<i64: 32, 16>}, {pipeline_mode = #tpu.pipeline_mode<synchronous>, transform_indices = @transform_6, window_bounds = array<i64: 1, 16>}, {pipeline_mode = #tpu.pipeline_mode<synchronous>, transform_indices = @transform_7, window_bounds = array<i64: 1, 16>}, {pipeline_mode = #tpu.pipeline_mode<synchronous>, transform_indices = @transform_8, window_bounds = array<i64: 1, 16>}, {transform_indices = @transform_9, window_bounds = array<i64: 2, 16>}]} {
    %c0 = arith.constant 0 : index
    %c0_0 = arith.constant 0 : index
    %0 = vector.load %arg1[%c0, %c0_0] : memref<2x16xf32, #tpu.memory_space<vmem>>, vector<2x16xf32>
    %c0_1 = arith.constant 0 : index
    %c0_2 = arith.constant 0 : index
    %1 = vector.load %arg2[%c0_1, %c0_2] : memref<16x224xf32, #tpu.memory_space<vmem>>, vector<16x224xf32>
    %cst = arith.constant dense<0.000000e+00> : vector<2x224xf32>
    %2 = tpu.matmul %0, %1, %cst {dimension_numbers = #tpu.dot_dimension_numbers<[1], [0], [0], [1], [0, 0, 1, 1], [], []>} : vector<2x16xf32>, vector<16x224xf32>, vector<2x224xf32> -> vector<2x224xf32>
    %c0_3 = arith.constant 0 : index
    %c0_4 = arith.constant 0 : index
    %3 = vector.load %arg3[%c0_3, %c0_4] : memref<1x224xf32, #tpu.memory_space<vmem>>, vector<1x224xf32>
    %4 = vector.broadcast %3 : vector<1x224xf32> to vector<2x224xf32>
    %5 = arith.addf %2, %4 : vector<2x224xf32>
    %cst_5 = arith.constant 0.000000e+00 : f32
    %6 = vector.broadcast %cst_5 : f32 to vector<2x224xf32>
    %7 = arith.maximumf %5, %6 : vector<2x224xf32>
    %c0_6 = arith.constant 0 : index
    %c0_7 = arith.constant 0 : index
    %8 = vector.load %arg4[%c0_6, %c0_7] : memref<224x32xf32, #tpu.memory_space<vmem>>, vector<224x32xf32>
    %cst_8 = arith.constant dense<0.000000e+00> : vector<2x32xf32>
    %9 = tpu.matmul %7, %8, %cst_8 {dimension_numbers = #tpu.dot_dimension_numbers<[1], [0], [0], [1], [0, 0, 1, 1], [], []>} : vector<2x224xf32>, vector<224x32xf32>, vector<2x32xf32> -> vector<2x32xf32>
    %c0_9 = arith.constant 0 : index
    %c0_10 = arith.constant 0 : index
    %10 = vector.load %arg5[%c0_9, %c0_10] : memref<1x32xf32, #tpu.memory_space<vmem>>, vector<1x32xf32>
    %11 = vector.broadcast %10 : vector<1x32xf32> to vector<2x32xf32>
    %12 = arith.addf %9, %11 : vector<2x32xf32>
    %cst_11 = arith.constant 0.000000e+00 : f32
    %13 = vector.broadcast %cst_11 : f32 to vector<2x32xf32>
    %14 = arith.maximumf %12, %13 : vector<2x32xf32>
    %c0_12 = arith.constant 0 : index
    %c0_13 = arith.constant 0 : index
    %15 = vector.load %arg6[%c0_12, %c0_13] : memref<32x16xf32, #tpu.memory_space<vmem>>, vector<32x16xf32>
    %cst_14 = arith.constant dense<0.000000e+00> : vector<2x16xf32>
    %16 = tpu.matmul %14, %15, %cst_14 {dimension_numbers = #tpu.dot_dimension_numbers<[1], [0], [0], [1], [0, 0, 1, 1], [], []>} : vector<2x32xf32>, vector<32x16xf32>, vector<2x16xf32> -> vector<2x16xf32>
    %c0_15 = arith.constant 0 : index
    %c0_16 = arith.constant 0 : index
    %17 = vector.load %arg7[%c0_15, %c0_16] : memref<1x16xf32, #tpu.memory_space<vmem>>, vector<1x16xf32>
    %18 = vector.broadcast %17 : vector<1x16xf32> to vector<2x16xf32>
    %19 = arith.addf %16, %18 : vector<2x16xf32>
    %cst_17 = arith.constant dense<0.000000e+00> : vector<2xf32>
    %20 = vector.multi_reduction <add>, %19, %cst_17 [1] : vector<2x16xf32> to vector<2xf32>
    %21 = vector.shape_cast %20 : vector<2xf32> to vector<2x1xf32>
    %22 = arith.mulf %19, %19 : vector<2x16xf32>
    %cst_18 = arith.constant dense<0.000000e+00> : vector<2xf32>
    %23 = vector.multi_reduction <add>, %22, %cst_18 [1] : vector<2x16xf32> to vector<2xf32>
    %24 = vector.shape_cast %23 : vector<2xf32> to vector<2x1xf32>
    %cst_19 = arith.constant 6.250000e-02 : f32
    %25 = vector.broadcast %cst_19 : f32 to vector<2x1xf32>
    %26 = arith.mulf %21, %25 : vector<2x1xf32>
    %cst_20 = arith.constant 6.250000e-02 : f32
    %27 = vector.broadcast %cst_20 : f32 to vector<2x1xf32>
    %28 = arith.mulf %24, %27 : vector<2x1xf32>
    %29 = arith.mulf %26, %26 : vector<2x1xf32>
    %30 = arith.subf %28, %29 : vector<2x1xf32>
    %31 = vector.broadcast %26 : vector<2x1xf32> to vector<2x16xf32>
    %32 = arith.subf %19, %31 : vector<2x16xf32>
    %cst_21 = arith.constant 9.99999974E-6 : f32
    %33 = vector.broadcast %cst_21 : f32 to vector<2x1xf32>
    %34 = arith.addf %30, %33 : vector<2x1xf32>
    %35 = math.rsqrt %34 : vector<2x1xf32>
    %36 = vector.broadcast %35 : vector<2x1xf32> to vector<2x16xf32>
    %37 = arith.mulf %32, %36 : vector<2x16xf32>
    %c0_22 = arith.constant 0 : index
    %c0_23 = arith.constant 0 : index
    %38 = vector.load %arg8[%c0_22, %c0_23] : memref<1x16xf32, #tpu.memory_space<vmem>>, vector<1x16xf32>
    %39 = vector.broadcast %38 : vector<1x16xf32> to vector<2x16xf32>
    %40 = arith.mulf %37, %39 : vector<2x16xf32>
    %c0_24 = arith.constant 0 : index
    %c0_25 = arith.constant 0 : index
    %41 = vector.load %arg9[%c0_24, %c0_25] : memref<1x16xf32, #tpu.memory_space<vmem>>, vector<1x16xf32>
    %42 = vector.broadcast %41 : vector<1x16xf32> to vector<2x16xf32>
    %43 = arith.addf %40, %42 : vector<2x16xf32>
    %44 = math.tanh %43 : vector<2x16xf32>
    %c0_26 = arith.constant 0 : index
    %c0_27 = arith.constant 0 : index
    %45 = vector.load %arg10[%c0_26, %c0_27] : memref<2x16xf32, #tpu.memory_space<vmem>>, vector<2x16xf32>
    tpu.vector_store %arg10[%c0_26, %c0_27], %44 {strides = array<i32>} : memref<2x16xf32, #tpu.memory_space<vmem>>, vector<2x16xf32>,
    return
  }
  func.func @transform_0(%arg0: i32) -> (i32, i32) {
    %c0_i32 = arith.constant 0 : i32
    %c0_i32_0 = arith.constant 0 : i32
    return %arg0, %c0_i32 : i32, i32
  }
  func.func @transform_1(%arg0: i32) -> (i32, i32) {
    %c0_i32 = arith.constant 0 : i32
    %c0_i32_0 = arith.constant 0 : i32
    %c0_i32_1 = arith.constant 0 : i32
    return %c0_i32, %c0_i32_0 : i32, i32
  }
  func.func @transform_2(%arg0: i32) -> (i32, i32) {
    %c0_i32 = arith.constant 0 : i32
    %c0_i32_0 = arith.constant 0 : i32
    %c0_i32_1 = arith.constant 0 : i32
    return %c0_i32, %c0_i32_0 : i32, i32
  }
  func.func @transform_3(%arg0: i32) -> (i32, i32) {
    %c0_i32 = arith.constant 0 : i32
    %c0_i32_0 = arith.constant 0 : i32
    %c0_i32_1 = arith.constant 0 : i32
    return %c0_i32, %c0_i32_0 : i32, i32
  }
  func.func @transform_4(%arg0: i32) -> (i32, i32) {
    %c0_i32 = arith.constant 0 : i32
    %c0_i32_0 = arith.constant 0 : i32
    %c0_i32_1 = arith.constant 0 : i32
    return %c0_i32, %c0_i32_0 : i32, i32
  }
  func.func @transform_5(%arg0: i32) -> (i32, i32) {
    %c0_i32 = arith.constant 0 : i32
    %c0_i32_0 = arith.constant 0 : i32
    %c0_i32_1 = arith.constant 0 : i32
    return %c0_i32, %c0_i32_0 : i32, i32
  }
  func.func @transform_6(%arg0: i32) -> (i32, i32) {
    %c0_i32 = arith.constant 0 : i32
    %c0_i32_0 = arith.constant 0 : i32
    %c0_i32_1 = arith.constant 0 : i32
    return %c0_i32, %c0_i32_0 : i32, i32
  }
  func.func @transform_7(%arg0: i32) -> (i32, i32) {
    %c0_i32 = arith.constant 0 : i32
    %c0_i32_0 = arith.constant 0 : i32
    %c0_i32_1 = arith.constant 0 : i32
    return %c0_i32, %c0_i32_0 : i32, i32
  }
  func.func @transform_8(%arg0: i32) -> (i32, i32) {
    %c0_i32 = arith.constant 0 : i32
    %c0_i32_0 = arith.constant 0 : i32
    %c0_i32_1 = arith.constant 0 : i32
    return %c0_i32, %c0_i32_0 : i32, i32
  }
  func.func @transform_9(%arg0: i32) -> (i32, i32) {
    %c0_i32 = arith.constant 0 : i32
    %c0_i32_0 = arith.constant 0 : i32
    return %arg0, %c0_i32 : i32, i32
  }
}

</mosaic_0001>

<bundles_post_ra>
// kernel: tpu_custom_call.1
= control target key start
LH: loop header
LB: loop body
LE: loop exit
PB: predicated region body
PF: predicated region fallthrough
CT: control target
= control target key end

     0   :  { %v477_v5 = vmov 0.0   ;;  %v478_v6 = vmov 0.0|0.0   ;;  %vm50_vm0 = vcmask 130048   ;;  %s690_s0 = inlined_call_operand.vmem [shape: f32[2,16], index: 0, kind: input, shape index: {}]   ;;  %s691_s1 = inlined_call_operand.vmem [shape: f32[16,224], index: 1, kind: input, shape index: {}]   ;;  %s692_s2 = inlined_call_operand.vmem [shape: f32[1,224], index: 2, kind: input, shape index: {}]   ;;  %s693_s3 = inlined_call_operand.vmem [shape: f32[224,32], index: 3, kind: input, shape index: {}]   ;;  %s694_s4 = inlined_call_operand.vmem [shape: f32[1,32], index: 4, kind: input, shape index: {}]   ;;  %s695_s5 = inlined_call_operand.vmem [shape: f32[32,16], index: 5, kind: input, shape index: {}]   ;;  %s696_s6 = inlined_call_operand.vmem [shape: f32[1,16], index: 6, kind: input, shape index: {}]   ;;  %s697_s7 = inlined_call_operand.vmem [shape: f32[1,16], index: 7, kind: input, shape index: {}]   ;;  %s698_s8 = inlined_call_operand.vmem [shape: f32[1,16], index: 8, kind: input, shape index: {}]   ;;  %s699_s9 = inlined_call_operand.hbm [shape: f32[2,16], index: 9, kind: output, shape index: {}]  }
   0x1   :  { %v35_v0 = vld [vmem:[%s691_s1 + $0x8] sm:$0xff]  ;;  %v37_v1 = vld [vmem:[%s691_s1 + $0x18] sm:$0xff]  ;;  %v34_v2 = vld [vmem:[%s691_s1] sm:$0xff]  ;;  %118 = vmatprep.mubr.f32.mxu0 %v477_v5  ;;  %397 = vmatprep.subr.bf16.mxu1 %v478_v6 }
   0x2   :  { %v393_v3 = vpack.c.bf16 %v37_v1, %v35_v0  ;;  %v36_v4 = vld [vmem:[%s691_s1 + $0x10] sm:$0xff]  ;;  %v127_v7 = vld [vmem:[%s693_s3] sm:$0xff]  ;;  %v128_v9 = vld [vmem:[%s693_s3 + $0x8] sm:$0xff] }
   0x3   :  { %v395_v8 = vpack.c.bf16 %v36_v4, %v34_v2  ;;  %v129_v10 = vld [vmem:[%s693_s3 + $0x10] sm:$0xff]  ;;  %v130_v11 = vld [vmem:[%s693_s3 + $0x18] sm:$0xff]  ;;  %v398_v12 = vpack.c.bf16 %v128_v9, %v127_v7  ;;  %v33_v13 = vld [vmem:[%s690_s0] sm:$0x3] }
   0x4   :  { %394 = vmatprep.subr.bf16.mxu0 %v393_v3  ;;  %v401_v14 = vpack.c.bf16 %v130_v11, %v129_v10  ;;  %v131_v15 = vld [vmem:[%s693_s3 + $0x20] sm:$0xff]  ;;  %v132_v16 = vld [vmem:[%s693_s3 + $0x28] sm:$0xff]  ;;  %v133_v18 = vld [vmem:[%s693_s3 + $0x30] sm:$0xff] }
   0x5   :  { %396 = vmatpush1.bf16.msra.mxu0 %v395_v8  ;;  %399 = vmatpush1.bf16.msra.mxu1 %v398_v12  ;;  %v404_v17 = vpack.c.bf16 %v132_v16, %v131_v15  ;;  %v134_v19 = vld [vmem:[%s693_s3 + $0x38] sm:$0xff] }
   0x6   :  { %439 = vmatprep.subr.bf16.mxu0 %v478_v6  ;;  %400 = vmatprep.subr.bf16.mxu1 %v478_v6 }
   0x8   :  { %370 = vmatmul.mubr.msk.f32.vlgmr.msra.gmra.mrb[0].mxu0 %vm50_vm0, %v33_v13 }
   0x9   :  { %402 = vmatpush1.bf16.msra.mxu1 %v401_v14 }
   0xa   :  { %403 = vmatprep.subr.bf16.mxu1 %v478_v6 }
   0xb   :  { %14 = vsyncpa [#allocation3], 0  ;;  %v407_v20 = vpack.c.bf16 %v134_v19, %v133_v18  ;;  %v135_v21 = vld [vmem:[%s693_s3 + $0x40] sm:$0xff]  ;;  %v136_v22 = vld [vmem:[%s693_s3 + $0x48] sm:$0xff]  ;;  %v40_v54 = vlaneseq  ;;  %vm162_vm1 = vcmask 785408   ;;  %vm479_vm2 = vmmov 0  }
   0xc   :  { %v410_v23 = vpack.c.bf16 %v136_v22, %v135_v21  ;;  %v137_v24 = vld [vmem:[%s693_s3 + $0x50] sm:$0xff]  ;;  %v138_v25 = vld [vmem:[%s693_s3 + $0x58] sm:$0xff]  ;;  %v139_v27 = vld [vmem:[%s693_s3 + $0x60] sm:$0xff]  ;;  %390 = vmatprep.mubr.msk.f32.mxu0 %vm479_vm2, %v477_v5  ;;  %vm248_vm3 = vcmask 261120   ;;  %vm322_vm4 = vcmask 123904   ;;  %s480_s19 = smov [#allocation2]  }
   0xd   :  { %405 = vmatpush1.bf16.msra.mxu1 %v404_v17  ;;  %v413_v26 = vpack.c.bf16 %v138_v25, %v137_v24  ;;  %v140_v28 = vld [vmem:[%s693_s3 + $0x68] sm:$0xff]  ;;  %v141_v30 = vld [vmem:[%s693_s3 + $0x70] sm:$0xff]  ;;  %v142_v31 = vld [vmem:[%s693_s3 + $0x78] sm:$0xff]  ;;  %v41_v55 = vshrl.u32 %v40_v54, 7  ;;  %s362_s20 = sshll.u32 %s480_s19, 4  ;;  %s363_s20 = int_to_ptr.vmem [resolvable:$true] %s362_s20 }
   0xe   :  { %406 = vmatprep.subr.bf16.mxu1 %v478_v6  ;;  %v416_v29 = vpack.c.bf16 %v140_v28, %v139_v27  ;;  %v419_v32 = vpack.c.bf16 %v142_v31, %v141_v30  ;;  %v143_v33 = vld [vmem:[%s693_s3 + $0x80] sm:$0xff]  ;;  %v144_v34 = vld [vmem:[%s693_s3 + $0x88] sm:$0xff]  ;;  %v145_v36 = vld [vmem:[%s693_s3 + $0x90] sm:$0xff]  ;;  %s453_s21 = scalar_lea.vmem %s363_s20, 32  ;;  %p458_p1 = scmp.lt.s32.totalorder %s363_s20, %s363_s20 }
   0xf   :  { %v422_v35 = vpack.c.bf16 %v144_v34, %v143_v33  ;;  %v146_v37 = vld [vmem:[%s693_s3 + $0x98] sm:$0xff]  ;;  %v147_v39 = vld [vmem:[%s693_s3 + $0xa0] sm:$0xff]  ;;  %v148_v40 = vld [vmem:[%s693_s3 + $0xa8] sm:$0xff]  ;;  %v42_v56 = vsub.s32 0, %v41_v55  ;;  %v46_v58 = vsub.s32 1, %v41_v55  ;;  %p454_p0 = scmp.ne.s32.totalorder %s363_s20, %s453_s21  ;;  %p459_p2 = scmp.lt.s32.totalorder %s453_s21, %s453_s21 }
  0x10   :  { %v425_v38 = vpack.c.bf16 %v146_v37, %v145_v36  ;;  %v428_v41 = vpack.c.bf16 %v148_v40, %v147_v39  ;;  %v149_v42 = vld [vmem:[%s693_s3 + $0xb0] sm:$0xff]  ;;  %v150_v43 = vld [vmem:[%s693_s3 + $0xb8] sm:$0xff]  ;;  %v151_v45 = vld [vmem:[%s693_s3 + $0xc0] sm:$0xff] }
  0x11   :  { %408 = vmatpush1.bf16.msra.mxu1 %v407_v20  ;;  %v431_v44 = vpack.c.bf16 %v150_v43, %v149_v42  ;;  %v152_v46 = vld [vmem:[%s693_s3 + $0xc8] sm:$0xff]  ;;  %v153_v48 = vld [vmem:[%s693_s3 + $0xd0] sm:$0xff]  ;;  %v154_v49 = vld [vmem:[%s693_s3 + $0xd8] sm:$0xff]  ;;  %p460_p3 = por %p459_p2, %p458_p1 }
  0x12   :  { %409 = vmatprep.subr.bf16.mxu1 %v478_v6  ;;  %v434_v47 = vpack.c.bf16 %v152_v46, %v151_v45  ;;  %v437_v50 = vpack.c.bf16 %v154_v49, %v153_v48  ;;  %v237_v51 = vld [vmem:[%s695_s5] sm:$0xff]  ;;  %v238_v52 = vld [vmem:[%s695_s5 + $0x8] sm:$0xff]  ;;  %v239_v3 = vld [vmem:[%s695_s5 + $0x10] sm:$0xff] }
  0x13   :  { %v440_v53 = vpack.c.bf16 %v238_v52, %v237_v51  ;;  %v38_v57 = vld [vmem:[%s692_s2] sm:$0x3]  ;;  %v240_v4 = vld [vmem:[%s695_s5 + $0x18] sm:$0xff]  ;;  %p461_p4 = pnand %p460_p3, %p454_p0 }
  0x14   :  { %v43_v59 = vrot.slane %v38_v57, %v42_v56  ;;  %v47_v60 = vrot.slane %v38_v57, %v46_v58  ;;  %v371_v7 = vld [vmem:[%s694_s4] ss:$0 sm:$0xff] }
  0x15   :  { %411 = vmatpush1.bf16.msra.mxu1 %v410_v23  ;;  %441 = vmatpush3.bf16.msra.mxu0 %v440_v53  ;;  %v373_v12 = vld [vmem:[%s696_s6] ss:$0 sm:$0xff] }
  0x16   :  { %412 = vmatprep.subr.bf16.mxu1 %v478_v6  ;;  %442 = vmatprep.subr.bf16.mxu0 %v478_v6  ;;  %v375_v27 = vld [vmem:[%s697_s7] ss:$0 sm:$0xff] }
  0x19   :  { %414 = vmatpush1.bf16.msra.mxu1 %v413_v26 }
  0x1a   :  { %415 = vmatprep.subr.bf16.mxu1 %v478_v6 }
  0x1d   :  { %417 = vmatpush1.bf16.msra.mxu1 %v416_v29  ;;  %v376_v29 = vld [vmem:[%s698_s8] ss:$0 sm:$0xff] }
  0x1e   :  { %418 = vmatprep.subr.bf16.mxu1 %v478_v6 }
  0x21   :  { %420 = vmatpush1.bf16.msra.mxu1 %v419_v32 }
  0x22   :  { %421 = vmatprep.subr.bf16.mxu1 %v478_v6 }
  0x25   :  { %423 = vmatpush1.bf16.msra.mxu1 %v422_v35 }
  0x26   :  { %424 = vmatprep.subr.bf16.mxu1 %v478_v6 }
  0x29   :  { %426 = vmatpush1.bf16.msra.mxu1 %v425_v38 }
  0x2a   :  { %427 = vmatprep.subr.bf16.mxu1 %v478_v6 }
  0x2d   :  { %429 = vmatpush1.bf16.msra.mxu1 %v428_v41 }
  0x2e   :  { %430 = vmatprep.subr.bf16.mxu1 %v478_v6 }
  0x31   :  { %432 = vmatpush1.bf16.msra.mxu1 %v431_v44 }
  0x32   :  { %433 = vmatprep.subr.bf16.mxu1 %v478_v6 }
  0x35   :  { %435 = vmatpush1.bf16.msra.mxu1 %v434_v47 }
  0x36   :  { %436 = vmatprep.subr.bf16.mxu1 %v478_v6  ;;  %v443_v6 = vpack.c.bf16 %v240_v4, %v239_v3 }
  0x38   :  { %444 = vmatpush3.bf16.msra.mxu0 %v443_v6 }
  0x39   :  { %438 = vmatpush1.bf16.msra.mxu1 %v437_v50 }
  0xdb   :  { %v120_v61 = vpop.f32.mrb[0].mxu0 }
  0xdc   :  { %v121_v62 = vadd.f32 %v120_v61, %v43_v59  ;;  %v122_v63 = vpop.f32.mrb[1].mxu0 }
  0xdd   :  { %v123_v0 = vadd.f32 %v122_v63, %v47_v60 }
  0xde   :  { %v125_v2 = vmax.f32 %v121_v62, 0.0 }
  0xdf   :  { %v126_v1 = vmax.f32 %v123_v0, 0.0 }
  0xe1   :  { %372 = vmatprep.mubr.msk.f32.mxu1 %vm162_vm1, %v126_v1 }
  0xe2   :  { %231 = vmatmul.mubr.f32.vlgmr.msra.gmra.mrb[0].mxu1 %v125_v2 }
 0x1b5   :  { %v232_v8 = vpop.f32.mrb[0].mxu1 }
 0x1b6   :  { %v233_v9 = vadd.f32 %v371_v7, %v232_v8  ;;  %v234_v10 = vpop.f32.mrb[1].mxu1 }
 0x1b8   :  { %v236_v11 = vmax.f32 %v233_v9, 0.0 }
 0x1ba   :  { %391 = vmatmul.mubr.msk.f32.vlgmr.msra.gmra.mrb[2].mxu0 %vm248_vm3, %v236_v11 }
 0x28d   :  { %v318_v13 = vpop.f32.mrb[2].mxu0 }
 0x28e   :  { %v319_v14 = vadd.f32 %v373_v12, %v318_v13  ;;  %v392_v15 = vpop.f32.mrb[3].mxu0 }
 0x290   :  { %v323_v5 = vsel %vm322_vm4, %v319_v14, 0.0  ;;  %v326_v16 = vmul.f32 %v319_v14, %v319_v14 }
 0x291   :  { %324 = vadd.xlane.f32.xlu0 %v323_v5 }
 0x292   :  { %v327_v17 = vsel %vm322_vm4, %v326_v16, 0.0 }
 0x295   :  { %328 = vadd.xlane.f32.xlu0 %v327_v17 }
 0x31e   :  { %v325_v18 = vpop.xlane.xlu0 %324 }
 0x31f   :  { %v330_v19 = vmul.f32 0.0625, %v325_v18 }
 0x321   :  { %v332_v21 = vmul.f32 %v330_v19, %v330_v19  ;;  %v334_v25 = vsub.f32 %v319_v14, %v330_v19 }
 0x322   :  { %v329_v20 = vpop.xlane.xlu0 %328 }
 0x323   :  { %v331_v22 = vmul.f32 0.0625, %v329_v20 }
 0x325   :  { %v333_v23 = vsub.f32 %v331_v22, %v332_v21 }
 0x327   :  { %v335_v24 = vadd.f32 1e-05, %v333_v23 }
 0x329   :  { %449 = vrsqrt.f32 %v335_v24 }
 0x333   :  { %v450_v26 = vpop.eup %449 }
 0x334   :  { %v337_v28 = vmul.f32 %v450_v26, %v334_v25 }
 0x336   :  { %v345_v30 = vmul.f32 %v375_v27, %v337_v28 }
 0x338   :  { %v353_v31 = vadd.f32 %v376_v29, %v345_v30 }
 0x33a   :  { %451 = vtanh.f32 %v353_v31 }
 0x344   :  { %v452_v32 = vpop.eup %451 }
 0x345   :  { %355 = vst.msk [vmem:[#allocation2] sm:$0x3] %vm322_vm4, %v452_v32 }
 0x346   :  { %464 = shalt.err (!%p461_p4)
}
 0x347   :  { %s465_s8 = scalar_lea.hbm %s699_s9, 32 }
 0x348   :  { %p466_p5 = scmp.ne.s32.totalorder %s699_s9, %s465_s8  ;;  %p469_p6 = scmp.lt.u32.totalorder %s465_s8, %s699_s9 }
 0x34a   :  { %p471_p7 = pnand %p469_p6, %p466_p5 }
 0x34c   :  { %474 = shalt.err (!%p471_p7)
}
 0x34d   :  { %365 = dma.vmem_to_hbm [thread:$0]  %s363_s20, 32, %s699_s9, [#allocation3]  }
 0x34e   :  { %475 = dma.done.wait [#allocation3], 32  }
 0x34f   :  { %476 = vsyncadd [#allocation3], 4294967264 }
 0x350   :  { %369 = vsyncpa [#allocation3], 1 }

</bundles_post_ra>
